<compile_context>
chip_gen: v6e
topology: v6e:2x2x1
jax: 0.10.0
libtpu: 0.0.40
codegen_flags: <defaults>
</compile_context>

<pallas_src>
import math

import jax
import jax.numpy as jnp
from jax.experimental import pallas as pl
from jax.experimental.pallas import tpu as pltpu


def _critic_kernel(x_ref,
                   w1_ref, b1_ref,
                   w2_ref, b2_ref,
                   w3_ref, b3_ref,
                   weff_ref, beff_ref,
                   q_ref):
    """One batch tile of the critic MLP (weights resident in VMEM)."""
    f32 = jnp.float32
    bf16 = jnp.bfloat16

    # fc1 on the pre-concatenated [tb, in_dims + n_actions] bf16 input.
    h = jnp.dot(x_ref[...], w1_ref[...], preferred_element_type=f32) + b1_ref[...]
    # Fuse ReLU with the bf16 downcast (single materialized copy of the intermediate).
    h = jnp.maximum(h, 0.0).astype(bf16)

    # fc2
    h = jnp.dot(h, w2_ref[...], preferred_element_type=f32) + b2_ref[...]
    h = jnp.maximum(h, 0.0).astype(bf16)

    # fc3 (output stays f32: it feeds the f32 VPU/XLU head below).
    h = jnp.dot(h, w3_ref[...], preferred_element_type=f32) + b3_ref[...]
    h = jnp.maximum(h, 0.0)

    # Folded fc4 + q head:  q = h3 @ (W4 @ Wq) + (b4 @ Wq + bq)
    # VPU multiply + XLU lane reduction (frees the MXU, avoids a masked N=1 matmul).
    q = jnp.sum(h * weff_ref[...], axis=-1, keepdims=True) + beff_ref[...]
    q_ref[...] = q.astype(q_ref.dtype)


def _round_up(x, m):
    return -(-x // m) * m


def critic_forward(state, action, params, *, batch_tile=2048):
    """state: [B, input_dims], action: [B, n_actions] -> q: [B, 1] (float32)."""
    B, in_dims = state.shape
    _, n_act = action.shape
    d_in = in_dims + n_act
    fc1 = params["b1"].shape[-1]
    fc2 = params["b2"].shape[-1]
    fc3 = params["b3"].shape[-1]

    # ---- tiny one-off parameter prepacking (outside the kernel) ------------
    # Exact fold of fc4 + q head (no ReLU between them in the reference), in f32.
    w_eff_row = (params["w4"] @ params["wq"]).reshape(1, fc3).astype(jnp.float32)  # [1, fc3]
    b_eff = (params["b4"] @ params["wq"] + params["bq"]).astype(jnp.float32)       # [1, 1]

    w1 = params["w1"].astype(jnp.bfloat16)
    w2 = params["w2"].astype(jnp.bfloat16)
    w3 = params["w3"].astype(jnp.bfloat16)
    b1 = params["b1"].astype(jnp.float32)
    b2 = params["b2"].astype(jnp.float32)
    b3 = params["b3"].astype(jnp.float32)

    # Pre-concatenate state||action once in the wrapper; fuses with the bf16 cast,
    # so the kernel does a single fc1 matmul and a single input DMA per grid step.
    x = jnp.concatenate([state, action], axis=1).astype(jnp.bfloat16)

    # ---- batch tiling -------------------------------------------------------
    # * multiple of 16 rows (bf16 sublane packing: 16 rows per sublane group),
    # * at least 2 grid steps when B allows (so "parallel" shards across v7x's 2 TCs),
    # * capped at batch_tile; resident footprint at tb=2048 is only a few MiB,
    #   far under the 32 MiB scoped-VMEM budget (and v7x's 64 MiB physical VMEM).
    tb = max(16, min(batch_tile, _round_up(pl.cdiv(B, 2), 16)))
    tb = _round_up(tb, 16)
    grid = (pl.cdiv(B, tb),)

    def const_spec(shape):
        return pl.BlockSpec(shape, lambda i: (0, 0))  # resident across the batch grid

    # Advisory cost estimate for XLA's scheduler (this kernel is microsecond-scale
    # inside a larger RL training step).
    flops = 2 * B * (d_in * fc1 + fc1 * fc2 + fc2 * fc3 + fc3)
    bytes_accessed = (
        2 * (d_in * fc1 + fc1 * fc2 + fc2 * fc3)          # bf16 weights
        + 4 * (fc1 + fc2 + fc3 + fc3 + 1)                 # f32 biases + folded head
        + 2 * B * d_in                                    # bf16 input
        + 4 * B                                           # f32 output
    )
    cost = pl.CostEstimate(flops=flops, transcendentals=0, bytes_accessed=bytes_accessed)

    # TODO(synk): for TD3 twin/target critics, stack both critics through this same
    # call (extra leading grid axis over critics, or W1..W3 widened to 512 columns)
    # so each launch carries enough work to hide DMA/launch overhead.

    return pl.pallas_call(
        _critic_kernel,
        out_shape=jax.ShapeDtypeStruct((B, 1), jnp.float32),
        grid=grid,
        in_specs=[
            pl.BlockSpec((tb, d_in), lambda i: (i, 0)),   # concatenated input tile
            const_spec((d_in, fc1)),                      # W1
            const_spec((1, fc1)),                         # b1
            const_spec((fc1, fc2)),                       # W2
            const_spec((1, fc2)),                         # b2
            const_spec((fc2, fc3)),                       # W3
            const_spec((1, fc3)),                         # b3
            const_spec((1, fc3)),                         # W_eff = (W4 @ Wq)^T row
            const_spec((1, 1)),                           # b_eff = b4 @ Wq + bq
        ],
        out_specs=pl.BlockSpec((tb, 1), lambda i: (i, 0)),
        compiler_params=pltpu.CompilerParams(
            dimension_semantics=("parallel",),            # shard batch tiles across TCs (v7x)
            vmem_limit_bytes=32 * 1024 * 1024,
        ),
        cost_estimate=cost,
    )(x, w1, b1, w2, b2, w3, b3, w_eff_row, b_eff)


# ----------------------------- params / reference -----------------------------

def _init_linear(key, fan_in, fan_out):
    """nn.Linear default init: U(-1/sqrt(fan_in), +1/sqrt(fan_in))."""
    kw, kb = jax.random.split(key)
    bound = 1.0 / math.sqrt(fan_in)
    w = jax.random.uniform(kw, (fan_in, fan_out), jnp.float32, -bound, bound)
    b = jax.random.uniform(kb, (1, fan_out), jnp.float32, -bound, bound)
    return w, b


def make_params(key, input_dims, n_actions, fc1=256, fc2=256, fc3=256, fc4=256):
    keys = jax.random.split(key, 5)
    d_in = input_dims + n_actions
    w1, b1 = _init_linear(keys[0], d_in, fc1)
    w2, b2 = _init_linear(keys[1], fc1, fc2)
    w3, b3 = _init_linear(keys[2], fc2, fc3)
    w4, b4 = _init_linear(keys[3], fc3, fc4)
    wq, bq = _init_linear(keys[4], fc4, 1)
    return dict(w1=w1, b1=b1, w2=w2, b2=b2, w3=w3, b3=b3,
                w4=w4, b4=b4, wq=wq, bq=bq)


def _reference_forward(state, action, p):
    """Pure f32 JAX reference with the original (unfolded) layer structure."""
    x = jnp.concatenate([state, action], axis=1)
    h = jax.nn.relu(x @ p["w1"] + p["b1"])
    h = jax.nn.relu(h @ p["w2"] + p["b2"])
    h = jax.nn.relu(h @ p["w3"] + p["b3"])
    h = h @ p["w4"] + p["b4"]
    return h @ p["wq"] + p["bq"]


if __name__ == "__main__":
    key = jax.random.PRNGKey(0)
    k_params, k_state, k_action = jax.random.split(key, 3)

    batch = 2          # tiny demo batch; real RL replay batches (256-2048) tile the grid
    input_dims = 16    # CriticNetwork(input_dims=[16], n_actions=4)
    n_actions = 4

    params = make_params(k_params, input_dims, n_actions)

    state = jax.random.normal(k_state, (batch, input_dims), jnp.float32)
    action = jax.random.normal(k_action, (batch, n_actions), jnp.float32)

    q = critic_forward(state, action, params)
    q = jax.block_until_ready(q)

    q_ref = _reference_forward(state, action, params)
    assert q.shape == (batch, 1), q.shape
    # bf16 MXU operands with f32 accumulation: expect <~1% deviation from the
    # pure-f32 reference for a 256-wide critic.
    assert jnp.allclose(q, q_ref, atol=2e-2, rtol=2e-2), (q, q_ref)

    print("KERNEL_OK")
</pallas_src>

<mosaic_0001>
module attributes {stable_mosaic.version = 11 : i64} {
  func.func @_critic_kernel(%arg0: i32, %arg1: memref<16x20xbf16, #tpu.memory_space<vmem>>, %arg2: memref<20x256xbf16, #tpu.memory_space<vmem>>, %arg3: memref<1x256xf32, #tpu.memory_space<vmem>>, %arg4: memref<256x256xbf16, #tpu.memory_space<vmem>>, %arg5: memref<1x256xf32, #tpu.memory_space<vmem>>, %arg6: memref<256x256xbf16, #tpu.memory_space<vmem>>, %arg7: memref<1x256xf32, #tpu.memory_space<vmem>>, %arg8: memref<1x256xf32, #tpu.memory_space<vmem>>, %arg9: memref<1x1xf32, #tpu.memory_space<vmem>>, %arg10: memref<16x1xf32, #tpu.memory_space<vmem>>) attributes {dimension_semantics = [#tpu.dimension_semantics<parallel>], iteration_bounds = array<i64: 1>, scalar_prefetch = 0 : i64, scratch_operands = 0 : i64, tpu.core_type = #tpu.core_type<tc>, window_params = [{transform_indices = @transform_0, window_bounds = array<i64: 16, 20>}, {pipeline_mode = #tpu.pipeline_mode<synchronous>, transform_indices = @transform_1, window_bounds = array<i64: 20, 256>}, {pipeline_mode = #tpu.pipeline_mode<synchronous>, transform_indices = @transform_2, window_bounds = array<i64: 1, 256>}, {pipeline_mode = #tpu.pipeline_mode<synchronous>, transform_indices = @transform_3, window_bounds = array<i64: 256, 256>}, {pipeline_mode = #tpu.pipeline_mode<synchronous>, transform_indices = @transform_4, window_bounds = array<i64: 1, 256>}, {pipeline_mode = #tpu.pipeline_mode<synchronous>, transform_indices = @transform_5, window_bounds = array<i64: 256, 256>}, {pipeline_mode = #tpu.pipeline_mode<synchronous>, transform_indices = @transform_6, window_bounds = array<i64: 1, 256>}, {pipeline_mode = #tpu.pipeline_mode<synchronous>, transform_indices = @transform_7, window_bounds = array<i64: 1, 256>}, {pipeline_mode = #tpu.pipeline_mode<synchronous>, transform_indices = @transform_8, window_bounds = array<i64: 1, 1>}, {transform_indices = @transform_9, window_bounds = array<i64: 16, 1>}]} {
    %c0 = arith.constant 0 : index
    %c0_0 = arith.constant 0 : index
    %0 = vector.load %arg1[%c0, %c0_0] : memref<16x20xbf16, #tpu.memory_space<vmem>>, vector<16x20xbf16>
    %c0_1 = arith.constant 0 : index
    %c0_2 = arith.constant 0 : index
    %1 = vector.load %arg2[%c0_1, %c0_2] : memref<20x256xbf16, #tpu.memory_space<vmem>>, vector<20x256xbf16>
    %cst = arith.constant dense<0.000000e+00> : vector<16x256xf32>
    %2 = tpu.matmul %0, %1, %cst {dimension_numbers = #tpu.dot_dimension_numbers<[1], [0], [0], [1], [0, 0, 1, 1], [], []>} : vector<16x20xbf16>, vector<20x256xbf16>, vector<16x256xf32> -> vector<16x256xf32>
    %c0_3 = arith.constant 0 : index
    %c0_4 = arith.constant 0 : index
    %3 = vector.load %arg3[%c0_3, %c0_4] : memref<1x256xf32, #tpu.memory_space<vmem>>, vector<1x256xf32>
    %4 = vector.broadcast %3 : vector<1x256xf32> to vector<16x256xf32>
    %5 = arith.addf %2, %4 : vector<16x256xf32>
    %cst_5 = arith.constant 0.000000e+00 : f32
    %6 = vector.broadcast %cst_5 : f32 to vector<16x256xf32>
    %7 = arith.maximumf %5, %6 : vector<16x256xf32>
    %8 = arith.truncf %7 : vector<16x256xf32> to vector<16x256xbf16>
    %c0_6 = arith.constant 0 : index
    %c0_7 = arith.constant 0 : index
    %9 = vector.load %arg4[%c0_6, %c0_7] : memref<256x256xbf16, #tpu.memory_space<vmem>>, vector<256x256xbf16>
    %cst_8 = arith.constant dense<0.000000e+00> : vector<16x256xf32>
    %10 = tpu.matmul %8, %9, %cst_8 {dimension_numbers = #tpu.dot_dimension_numbers<[1], [0], [0], [1], [0, 0, 1, 1], [], []>} : vector<16x256xbf16>, vector<256x256xbf16>, vector<16x256xf32> -> vector<16x256xf32>
    %c0_9 = arith.constant 0 : index
    %c0_10 = arith.constant 0 : index
    %11 = vector.load %arg5[%c0_9, %c0_10] : memref<1x256xf32, #tpu.memory_space<vmem>>, vector<1x256xf32>
    %12 = vector.broadcast %11 : vector<1x256xf32> to vector<16x256xf32>
    %13 = arith.addf %10, %12 : vector<16x256xf32>
    %cst_11 = arith.constant 0.000000e+00 : f32
    %14 = vector.broadcast %cst_11 : f32 to vector<16x256xf32>
    %15 = arith.maximumf %13, %14 : vector<16x256xf32>
    %16 = arith.truncf %15 : vector<16x256xf32> to vector<16x256xbf16>
    %c0_12 = arith.constant 0 : index
    %c0_13 = arith.constant 0 : index
    %17 = vector.load %arg6[%c0_12, %c0_13] : memref<256x256xbf16, #tpu.memory_space<vmem>>, vector<256x256xbf16>
    %cst_14 = arith.constant dense<0.000000e+00> : vector<16x256xf32>
    %18 = tpu.matmul %16, %17, %cst_14 {dimension_numbers = #tpu.dot_dimension_numbers<[1], [0], [0], [1], [0, 0, 1, 1], [], []>} : vector<16x256xbf16>, vector<256x256xbf16>, vector<16x256xf32> -> vector<16x256xf32>
    %c0_15 = arith.constant 0 : index
    %c0_16 = arith.constant 0 : index
    %19 = vector.load %arg7[%c0_15, %c0_16] : memref<1x256xf32, #tpu.memory_space<vmem>>, vector<1x256xf32>
    %20 = vector.broadcast %19 : vector<1x256xf32> to vector<16x256xf32>
    %21 = arith.addf %18, %20 : vector<16x256xf32>
    %cst_17 = arith.constant 0.000000e+00 : f32
    %22 = vector.broadcast %cst_17 : f32 to vector<16x256xf32>
    %23 = arith.maximumf %21, %22 : vector<16x256xf32>
    %c0_18 = arith.constant 0 : index
    %c0_19 = arith.constant 0 : index
    %24 = vector.load %arg8[%c0_18, %c0_19] : memref<1x256xf32, #tpu.memory_space<vmem>>, vector<1x256xf32>
    %25 = vector.broadcast %24 : vector<1x256xf32> to vector<16x256xf32>
    %26 = arith.mulf %23, %25 : vector<16x256xf32>
    %cst_20 = arith.constant dense<0.000000e+00> : vector<16xf32>
    %27 = vector.multi_reduction <add>, %26, %cst_20 [1] : vector<16x256xf32> to vector<16xf32>
    %28 = vector.shape_cast %27 : vector<16xf32> to vector<16x1xf32>
    %c0_21 = arith.constant 0 : index
    %c0_22 = arith.constant 0 : index
    %29 = vector.load %arg9[%c0_21, %c0_22] : memref<1x1xf32, #tpu.memory_space<vmem>>, vector<1x1xf32>
    %30 = vector.broadcast %29 : vector<1x1xf32> to vector<16x1xf32>
    %31 = arith.addf %28, %30 : vector<16x1xf32>
    %c0_23 = arith.constant 0 : index
    %c0_24 = arith.constant 0 : index
    %32 = vector.load %arg10[%c0_23, %c0_24] : memref<16x1xf32, #tpu.memory_space<vmem>>, vector<16x1xf32>
    tpu.vector_store %arg10[%c0_23, %c0_24], %31 {strides = array<i32>} : memref<16x1xf32, #tpu.memory_space<vmem>>, vector<16x1xf32>,
    return
  }
  func.func @transform_0(%arg0: i32) -> (i32, i32) {
    %c0_i32 = arith.constant 0 : i32
    %c0_i32_0 = arith.constant 0 : i32
    return %arg0, %c0_i32 : i32, i32
  }
  func.func @transform_1(%arg0: i32) -> (i32, i32) {
    %c0_i32 = arith.constant 0 : i32
    %c0_i32_0 = arith.constant 0 : i32
    %c0_i32_1 = arith.constant 0 : i32
    return %c0_i32, %c0_i32_0 : i32, i32
  }
  func.func @transform_2(%arg0: i32) -> (i32, i32) {
    %c0_i32 = arith.constant 0 : i32
    %c0_i32_0 = arith.constant 0 : i32
    %c0_i32_1 = arith.constant 0 : i32
    return %c0_i32, %c0_i32_0 : i32, i32
  }
  func.func @transform_3(%arg0: i32) -> (i32, i32) {
    %c0_i32 = arith.constant 0 : i32
    %c0_i32_0 = arith.constant 0 : i32
    %c0_i32_1 = arith.constant 0 : i32
    return %c0_i32, %c0_i32_0 : i32, i32
  }
  func.func @transform_4(%arg0: i32) -> (i32, i32) {
    %c0_i32 = arith.constant 0 : i32
    %c0_i32_0 = arith.constant 0 : i32
    %c0_i32_1 = arith.constant 0 : i32
    return %c0_i32, %c0_i32_0 : i32, i32
  }
  func.func @transform_5(%arg0: i32) -> (i32, i32) {
    %c0_i32 = arith.constant 0 : i32
    %c0_i32_0 = arith.constant 0 : i32
    %c0_i32_1 = arith.constant 0 : i32
    return %c0_i32, %c0_i32_0 : i32, i32
  }
  func.func @transform_6(%arg0: i32) -> (i32, i32) {
    %c0_i32 = arith.constant 0 : i32
    %c0_i32_0 = arith.constant 0 : i32
    %c0_i32_1 = arith.constant 0 : i32
    return %c0_i32, %c0_i32_0 : i32, i32
  }
  func.func @transform_7(%arg0: i32) -> (i32, i32) {
    %c0_i32 = arith.constant 0 : i32
    %c0_i32_0 = arith.constant 0 : i32
    %c0_i32_1 = arith.constant 0 : i32
    return %c0_i32, %c0_i32_0 : i32, i32
  }
  func.func @transform_8(%arg0: i32) -> (i32, i32) {
    %c0_i32 = arith.constant 0 : i32
    %c0_i32_0 = arith.constant 0 : i32
    %c0_i32_1 = arith.constant 0 : i32
    return %c0_i32, %c0_i32_0 : i32, i32
  }
  func.func @transform_9(%arg0: i32) -> (i32, i32) {
    %c0_i32 = arith.constant 0 : i32
    %c0_i32_0 = arith.constant 0 : i32
    return %arg0, %c0_i32 : i32, i32
  }
}

</mosaic_0001>

<bundles_post_ra>
// kernel: tpu_custom_call.1
= control target key start
LH: loop header
LB: loop body
LE: loop exit
PB: predicated region body
PF: predicated region fallthrough
CT: control target
= control target key end

     0   :  { %s1168_s0 = inlined_call_operand.vmem [shape: bf16[2,20], index: 0, kind: input, shape index: {}]   ;;  %s1169_s1 = inlined_call_operand.hbm [shape: bf16[20,256], index: 1, kind: input, shape index: {}]   ;;  %s1170_s2 = inlined_call_operand.vmem [shape: f32[1,256], index: 2, kind: input, shape index: {}]   ;;  %s1171_s3 = inlined_call_operand.hbm [shape: bf16[256,256], index: 3, kind: input, shape index: {}]   ;;  %s1172_s4 = inlined_call_operand.vmem [shape: f32[1,256], index: 4, kind: input, shape index: {}]   ;;  %s1173_s5 = inlined_call_operand.hbm [shape: bf16[256,256], index: 5, kind: input, shape index: {}]   ;;  %s1174_s6 = inlined_call_operand.vmem [shape: f32[1,256], index: 6, kind: input, shape index: {}]   ;;  %s1175_s7 = inlined_call_operand.vmem [shape: f32[1,256], index: 7, kind: input, shape index: {}]   ;;  %s1176_s8 = inlined_call_operand.<no memory space> [shape: f32[1,1], index: 8, kind: input, shape index: {}]   ;;  %s1177_s9 = inlined_call_operand.vmem [shape: f32[2,1], index: 9, kind: output, shape index: {}]  }
   0x1   :  { %v14_v0 = vstv %s1176_s8 }
   0x2   :  { %15 = vst [vmem:[#allocation2] sm:$0x1] %v14_v0 }
   0x3   :  { %16 = vsyncpa [#allocation4], 0 }
   0x4   :  { %17 = vsyncpa [#allocation6], 0  ;;  %s1055_s11 = smov [#allocation5]   ;;  %s1056_s13 = smov [#allocation3]  }
   0x5   :  { %s39_s12 = sshll.u32 %s1055_s11, 4  ;;  %s25_s14 = sshll.u32 %s1056_s13, 4  ;;  %s40_s12 = int_to_ptr.vmem [resolvable:$true] %s39_s12  ;;  %s26_s14 = int_to_ptr.vmem [resolvable:$true] %s25_s14 }
   0x6   :  { %s999_s15 = scalar_lea.vmem %s40_s12, 4096  ;;  %p1004_p1 = scmp.lt.s32.totalorder %s40_s12, %s40_s12 }
   0x7   :  { %p1000_p0 = scmp.ne.s32.totalorder %s40_s12, %s999_s15  ;;  %p1005_p2 = scmp.lt.s32.totalorder %s999_s15, %s999_s15 }
   0x9   :  { %p1006_p3 = por %p1005_p2, %p1004_p1 }
   0xb   :  { %p1007_p4 = pnand %p1006_p3, %p1000_p0 }
   0xd   :  { %1010 = shalt.err (!%p1007_p4)
}
   0xe   :  { %s1057_s16 = smov 128   ;;  %s1058_s17 = smov 8  }
   0xf   :  { %45 = dma.hbm_to_vmem [thread:$0]  %s1171_s3, 4096, %s40_s12, [#allocation6], %s1057_s16, %s1057_s16, %s1058_s17  }
  0x10   :  { %s1019_s19 = scalar_lea.vmem %s26_s14, 384  ;;  %p1024_p6 = scmp.lt.s32.totalorder %s26_s14, %s26_s14 }
  0x11   :  { %p1020_p5 = scmp.ne.s32.totalorder %s26_s14, %s1019_s19  ;;  %p1025_p7 = scmp.lt.s32.totalorder %s1019_s19, %s1019_s19 }
  0x13   :  { %p1026_p8 = por %p1025_p7, %p1024_p6 }
  0x15   :  { %p1027_p9 = pnand %p1026_p8, %p1020_p5 }
  0x17   :  { %1030 = shalt.err (!%p1027_p9)
}
  0x18   :  { %31 = dma.hbm_to_vmem [thread:$0]  %s1169_s1, 384, %s26_s14, [#allocation4], %s1057_s16, %s1057_s16, %s1058_s17  }
  0x19   :  { %s1059_s22 = smov [#allocation7]  }
  0x1a   :  { %s53_s23 = sshll.u32 %s1059_s22, 4  ;;  %s54_s23 = int_to_ptr.vmem [resolvable:$true] %s53_s23 }
  0x1b   :  { %s1039_s24 = scalar_lea.vmem %s54_s23, 4096  ;;  %p1044_p11 = scmp.lt.s32.totalorder %s54_s23, %s54_s23 }
  0x1c   :  { %p1040_p10 = scmp.ne.s32.totalorder %s54_s23, %s1039_s24  ;;  %p1045_p12 = scmp.lt.s32.totalorder %s1039_s24, %s1039_s24 }
  0x1e   :  { %p1046_p13 = por %p1045_p12, %p1044_p11 }
  0x20   :  { %p1047_p0 = pnand %p1046_p13, %p1040_p10 }
  0x22   :  { %1050 = shalt.err (!%p1047_p0)
}
  0x23   :  { %59 = dma.hbm_to_vmem [thread:$0]  %s1173_s5, 4096, %s54_s23, [#allocation6], %s1057_s16, %s1057_s16, %s1058_s17  }
  0x24   :  { %1051 = dma.done.wait [#allocation4], 384  }
  0x25   :  { %1052 = vsyncadd [#allocation4], 4294966912 }
  0x26   :  { %1053 = dma.done.wait [#allocation6], 8192  }
  0x27   :  { %1054 = vsyncadd [#allocation6], 4294959104  ;;  %v89_v1 = vlaneseq  ;;  %v1060_v2 = vmov 0   ;;  %v1061_v3 = vmov 1966171168   ;;  %vm175_vm0 = vcmask 1041408  }
  0x28   :  { %214 = vmatprep.mubr.bf16.mxu0 %v1060_v2  ;;  %v112_v4 = vunpack.c.l.s4 %v1061_v3  ;;  %v86_v7 = vld [vmem:[#allocation3 + $0x10] sm:$0x33]  ;;  %v892_v10 = vld [vmem:[#allocation3 + $0x4] ss:$8 sps:$4 sm:$0xff]   ;;  %v76_v11 = vld [vmem:[%s1168_s0] sm:$0x1] }
  0x29   :  { %v1124_v5 = vshrl.u32 %v89_v1, 7  ;;  %v815_v8 = vcombine.high %v86_v7, %v86_v7  ;;  %v814_v9 = vcombine.low %v86_v7, %v86_v7  ;;  %v894_v13 = vld [vmem:[#allocation3] ss:$8 sps:$4 sm:$0xff]   ;;  %v81_v19 = vld [vmem:[%s1168_s0 + $0x5] sm:$0x1]  ;;  %vm171_vm1 = vcmask 162816  }
  0x2a   :  { %v113_v6 = vunpack.c.0.s8 %v112_v4  ;;  %v77_v14 = vld [vmem:[%s1168_s0 + $0x1] sm:$0x1]  ;;  %v78_v15 = vld [vmem:[%s1168_s0 + $0x2] sm:$0x1]  ;;  %v79_v16 = vld [vmem:[%s1168_s0 + $0x3] sm:$0x1] }
  0x2b   :  { %816 = vmatprep.subr.msk.bf16.mxu0 %vm175_vm0, %v815_v8  ;;  %v177_v17 = vsel %vm175_vm0, %v814_v9, 0  ;;  %v80_v18 = vld [vmem:[%s1168_s0 + $0x4] sm:$0x1]  ;;  %v107_v20 = vcombine.low %v76_v11, %v77_v14  ;;  %v108_v21 = vcombine.low %v78_v15, %v79_v16  ;;  %v82_v22 = vld [vmem:[%s1168_s0 + $0x6] sm:$0x1]  ;;  %vm766_vm2 = vcmask 7168  }
  0x2c   :  { %v116_v12 = vsub.s32 %v113_v6, %v1124_v5  ;;  %195 = vmatpush1.bf16.msra.mxu0 %v177_v17  ;;  %v83_v23 = vld [vmem:[%s1168_s0 + $0x7] sm:$0x1]  ;;  %v109_v24 = vcombine.low %v80_v18, %v81_v19  ;;  %v895_v28 = vld [vmem:[#allocation5 + $0x74] ss:$8 sps:$4 sm:$0xff]   ;;  %v897_v29 = vld [vmem:[#allocation5 + $0x70] ss:$8 sps:$4 sm:$0xff]  }
  0x2d   :  { %196 = vmatprep.subr.bf16.mxu0 %v892_v10  ;;  %v110_v25 = vcombine.low %v82_v22, %v83_v23  ;;  %v898_v31 = vld [vmem:[#allocation5 + $0x64] ss:$8 sps:$4 sm:$0xff]   ;;  %435 = vmatprep.subr.bf16.mxu1 %v895_v28  ;;  %v900_v34 = vld [vmem:[#allocation5 + $0x60] ss:$8 sps:$4 sm:$0xff]   ;;  %v901_v37 = vld [vmem:[#allocation5 + $0x54] ss:$8 sps:$4 sm:$0xff]  }
  0x2e   :  { %v117_v26 = vrot.slane %v107_v20, %v116_v12  ;;  %v124_v27 = vrot.slane %v108_v21, %v116_v12  ;;  %v131_v30 = vrot.slane %v109_v24, %v116_v12  ;;  %436 = vmatpush1.bf16.msra.mxu1 %v897_v29  ;;  %v903_v39 = vld [vmem:[#allocation5 + $0x50] ss:$8 sps:$4 sm:$0xff]   ;;  %v904_v41 = vld [vmem:[#allocation5 + $0x44] ss:$8 sps:$4 sm:$0xff]   ;;  %v906_v42 = vld [vmem:[#allocation5 + $0x40] ss:$8 sps:$4 sm:$0xff]  }
  0x2f   :  { %v138_v32 = vrot.slane %v110_v25, %v116_v12  ;;  %437 = vmatprep.subr.bf16.mxu1 %v898_v31  ;;  %v907_v43 = vld [vmem:[#allocation5 + $0x34] ss:$8 sps:$4 sm:$0xff]   ;;  %v909_v44 = vld [vmem:[#allocation5 + $0x30] ss:$8 sps:$4 sm:$0xff]   ;;  %v910_v45 = vld [vmem:[#allocation5 + $0x24] ss:$8 sps:$4 sm:$0xff]  }
  0x30   :  { %v139_v33 = vcombine.low %v117_v26, %v124_v27  ;;  %197 = vmatpush1.bf16.msra.mxu0 %v894_v13  ;;  %v912_v46 = vld [vmem:[#allocation5 + $0x20] ss:$8 sps:$4 sm:$0xff]   ;;  %v913_v47 = vld [vmem:[#allocation5 + $0x14] ss:$8 sps:$4 sm:$0xff]   ;;  %v915_v48 = vld [vmem:[#allocation5 + $0x10] ss:$8 sps:$4 sm:$0xff]  }
  0x31   :  { %v140_v35 = vcombine.low %v131_v30, %v138_v32  ;;  %v916_v49 = vld [vmem:[#allocation5 + $0x4] ss:$8 sps:$4 sm:$0xff]   ;;  %v918_v50 = vld [vmem:[#allocation5] ss:$8 sps:$4 sm:$0xff]   ;;  %v919_v51 = vld [vmem:[#allocation5 + $0xf4] ss:$8 sps:$4 sm:$0xff]  }
  0x32   :  { %v147_v36 = vrot.slane %v139_v33, %v116_v12  ;;  %438 = vmatpush1.bf16.msra.mxu1 %v900_v34  ;;  %v921_v52 = vld [vmem:[#allocation5 + $0xf0] ss:$8 sps:$4 sm:$0xff]   ;;  %v922_v53 = vld [vmem:[#allocation5 + $0xe4] ss:$8 sps:$4 sm:$0xff]   ;;  %v924_v54 = vld [vmem:[#allocation5 + $0xe0] ss:$8 sps:$4 sm:$0xff]  }
  0x33   :  { %v154_v38 = vrot.slane %v140_v35, %v116_v12  ;;  %439 = vmatprep.subr.bf16.mxu1 %v901_v37  ;;  %v925_v55 = vld [vmem:[#allocation5 + $0xd4] ss:$8 sps:$4 sm:$0xff]   ;;  %v927_v56 = vld [vmem:[#allocation5 + $0xd0] ss:$8 sps:$4 sm:$0xff]   ;;  %v928_v57 = vld [vmem:[#allocation5 + $0xc4] ss:$8 sps:$4 sm:$0xff]  }
  0x34   :  { %v930_v58 = vld [vmem:[#allocation5 + $0xc0] ss:$8 sps:$4 sm:$0xff]   ;;  %v931_v59 = vld [vmem:[#allocation5 + $0xb4] ss:$8 sps:$4 sm:$0xff]   ;;  %v933_v60 = vld [vmem:[#allocation5 + $0xb0] ss:$8 sps:$4 sm:$0xff]  }
  0x35   :  { %v155_v40 = vcombine.low %v147_v36, %v154_v38  ;;  %v934_v61 = vld [vmem:[#allocation5 + $0xa4] ss:$8 sps:$4 sm:$0xff]   ;;  %v936_v62 = vld [vmem:[#allocation5 + $0xa0] ss:$8 sps:$4 sm:$0xff]   ;;  %v937_v63 = vld [vmem:[#allocation5 + $0x94] ss:$8 sps:$4 sm:$0xff]  }
  0x36   :  { %440 = vmatpush1.bf16.msra.mxu1 %v903_v39  ;;  %v939_v0 = vld [vmem:[#allocation5 + $0x90] ss:$8 sps:$4 sm:$0xff]   ;;  %v940_v1 = vld [vmem:[#allocation5 + $0x84] ss:$8 sps:$4 sm:$0xff]   ;;  %v942_v2 = vld [vmem:[#allocation5 + $0x80] ss:$8 sps:$4 sm:$0xff]  }
  0x37   :  { %817 = vmatmul.mubr.msk.bf16.vlgmr.msra.gmra.mxu0 %vm171_vm1, %v155_v40  ;;  %441 = vmatprep.subr.bf16.mxu1 %v904_v41  ;;  %v943_v3 = vld [vmem:[#allocation7 + $0x70] ss:$8 sps:$4 sm:$0xff]   ;;  %v945_v4 = vld [vmem:[#allocation7 + $0x74] ss:$8 sps:$4 sm:$0xff]   ;;  %v948_v6 = vld [vmem:[#allocation7 + $0x64] ss:$8 sps:$4 sm:$0xff]  }
  0x38   :  { %688 = vmatprep.subr.bf16.mxu0 %v945_v4  ;;  %v946_v7 = vld [vmem:[#allocation7 + $0x60] ss:$8 sps:$4 sm:$0xff]   ;;  %v951_v8 = vld [vmem:[#allocation7 + $0x54] ss:$8 sps:$4 sm:$0xff]   ;;  %v949_v9 = vld [vmem:[#allocation7 + $0x50] ss:$8 sps:$4 sm:$0xff]  }
  0x39   :  { %689 = vmatpush1.bf16.msra.mxu0 %v943_v3  ;;  %v954_v10 = vld [vmem:[#allocation7 + $0x44] ss:$8 sps:$4 sm:$0xff]   ;;  %v952_v11 = vld [vmem:[#allocation7 + $0x40] ss:$8 sps:$4 sm:$0xff]   ;;  %v957_v12 = vld [vmem:[#allocation7 + $0x34] ss:$8 sps:$4 sm:$0xff]  }
  0x3a   :  { %442 = vmatpush1.bf16.msra.mxu1 %v906_v42  ;;  %690 = vmatprep.subr.bf16.mxu0 %v948_v6  ;;  %v955_v13 = vld [vmem:[#allocation7 + $0x30] ss:$8 sps:$4 sm:$0xff]   ;;  %v960_v14 = vld [vmem:[#allocation7 + $0x24] ss:$8 sps:$4 sm:$0xff]   ;;  %v958_v15 = vld [vmem:[#allocation7 + $0x20] ss:$8 sps:$4 sm:$0xff]  }
  0x3b   :  { %443 = vmatprep.subr.bf16.mxu1 %v907_v43  ;;  %v963_v16 = vld [vmem:[#allocation7 + $0x14] ss:$8 sps:$4 sm:$0xff]   ;;  %v961_v17 = vld [vmem:[#allocation7 + $0x10] ss:$8 sps:$4 sm:$0xff]   ;;  %v966_v18 = vld [vmem:[#allocation7 + $0x4] ss:$8 sps:$4 sm:$0xff]  }
  0x3c   :  { %v964_v19 = vld [vmem:[#allocation7] ss:$8 sps:$4 sm:$0xff]   ;;  %v969_v20 = vld [vmem:[#allocation7 + $0xf4] ss:$8 sps:$4 sm:$0xff]   ;;  %v967_v21 = vld [vmem:[#allocation7 + $0xf0] ss:$8 sps:$4 sm:$0xff]  }
  0x3d   :  { %691 = vmatpush1.bf16.msra.mxu0 %v946_v7  ;;  %v972_v22 = vld [vmem:[#allocation7 + $0xe4] ss:$8 sps:$4 sm:$0xff]   ;;  %v970_v23 = vld [vmem:[#allocation7 + $0xe0] ss:$8 sps:$4 sm:$0xff]   ;;  %v975_v24 = vld [vmem:[#allocation7 + $0xd4] ss:$8 sps:$4 sm:$0xff]  }
  0x3e   :  { %444 = vmatpush1.bf16.msra.mxu1 %v909_v44  ;;  %692 = vmatprep.subr.bf16.mxu0 %v951_v8  ;;  %v973_v25 = vld [vmem:[#allocation7 + $0xd0] ss:$8 sps:$4 sm:$0xff]   ;;  %v978_v26 = vld [vmem:[#allocation7 + $0xc4] ss:$8 sps:$4 sm:$0xff]   ;;  %v976_v27 = vld [vmem:[#allocation7 + $0xc0] ss:$8 sps:$4 sm:$0xff]  }
  0x3f   :  { %445 = vmatprep.subr.bf16.mxu1 %v910_v45  ;;  %v981_v28 = vld [vmem:[#allocation7 + $0xb4] ss:$8 sps:$4 sm:$0xff]   ;;  %v979_v29 = vld [vmem:[#allocation7 + $0xb0] ss:$8 sps:$4 sm:$0xff]   ;;  %v95_v30 = vsub.s32 1, %v1124_v5  ;;  %v91_v31 = vsub.s32 0, %v1124_v5 }
  0x40   :  { %v87_v32 = vld [vmem:[%s1170_s2] sm:$0x3] }
  0x41   :  { %693 = vmatpush1.bf16.msra.mxu0 %v949_v9  ;;  %v96_v34 = vrot.slane %v87_v32, %v95_v30  ;;  %v92_v35 = vrot.slane %v87_v32, %v91_v31  ;;  %v516_v8 = vld [vmem:[%s1174_s6] sm:$0x3] }
  0x42   :  { %446 = vmatpush1.bf16.msra.mxu1 %v912_v46  ;;  %694 = vmatprep.subr.bf16.mxu0 %v954_v10  ;;  %v521_v9 = vrot.slane %v516_v8, %v91_v31  ;;  %v525_v10 = vrot.slane %v516_v8, %v95_v30 }
  0x43   :  { %447 = vmatprep.subr.bf16.mxu1 %v913_v47 }
  0x45   :  { %695 = vmatpush1.bf16.msra.mxu0 %v952_v11 }
  0x46   :  { %448 = vmatpush1.bf16.msra.mxu1 %v915_v48  ;;  %696 = vmatprep.subr.bf16.mxu0 %v957_v12  ;;  %v984_v48 = vld [vmem:[#allocation7 + $0xa4] ss:$8 sps:$4 sm:$0xff]  }
  0x47   :  { %449 = vmatprep.subr.bf16.mxu1 %v916_v49  ;;  %v982_v49 = vld [vmem:[#allocation7 + $0xa0] ss:$8 sps:$4 sm:$0xff]  }
  0x48   :  { %v735_v12 = vld [vmem:[%s1175_s7] sm:$0x3] }
  0x49   :  { %697 = vmatpush1.bf16.msra.mxu0 %v955_v13 }
  0x4a   :  { %450 = vmatpush1.bf16.msra.mxu1 %v918_v50  ;;  %698 = vmatprep.subr.bf16.mxu0 %v960_v14  ;;  %v987_v50 = vld [vmem:[#allocation7 + $0x94] ss:$8 sps:$4 sm:$0xff]  }
  0x4b   :  { %451 = vmatprep.subr.bf16.mxu1 %v919_v51  ;;  %v985_v51 = vld [vmem:[#allocation7 + $0x90] ss:$8 sps:$4 sm:$0xff]  }
  0x4d   :  { %699 = vmatpush1.bf16.msra.mxu0 %v958_v15 }
  0x4e   :  { %452 = vmatpush2.bf16.msra.mxu1 %v921_v52  ;;  %700 = vmatprep.subr.bf16.mxu0 %v963_v16  ;;  %v990_v52 = vld [vmem:[#allocation7 + $0x84] ss:$8 sps:$4 sm:$0xff]  }
  0x4f   :  { %453 = vmatprep.subr.bf16.mxu1 %v922_v53  ;;  %v988_v53 = vld [vmem:[#allocation7 + $0x80] ss:$8 sps:$4 sm:$0xff]  }
  0x51   :  { %701 = vmatpush1.bf16.msra.mxu0 %v961_v17  ;;  %v740_v17 = vrot.slane %v735_v12, %v91_v31 }
  0x52   :  { %454 = vmatpush2.bf16.msra.mxu1 %v924_v54  ;;  %702 = vmatprep.subr.bf16.mxu0 %v966_v18  ;;  %v263_v54 = vld [vmem:[%s1172_s4] sm:$0x3]  ;;  %v744_v18 = vrot.slane %v735_v12, %v95_v30 }
  0x53   :  { %455 = vmatprep.subr.bf16.mxu1 %v925_v55 }
  0x55   :  { %703 = vmatpush1.bf16.msra.mxu0 %v964_v19 }
  0x56   :  { %456 = vmatpush2.bf16.msra.mxu1 %v927_v56  ;;  %704 = vmatprep.subr.bf16.mxu0 %v969_v20  ;;  %v272_v56 = vrot.slane %v263_v54, %v95_v30 }
  0x57   :  { %457 = vmatprep.subr.bf16.mxu1 %v928_v57  ;;  %v268_v57 = vrot.slane %v263_v54, %v91_v31 }
  0x59   :  { %705 = vmatpush2.bf16.msra.mxu0 %v967_v21 }
  0x5a   :  { %458 = vmatpush2.bf16.msra.mxu1 %v930_v58  ;;  %706 = vmatprep.subr.bf16.mxu0 %v972_v22 }
  0x5b   :  { %459 = vmatprep.subr.bf16.mxu1 %v931_v59 }
  0x5d   :  { %707 = vmatpush2.bf16.msra.mxu0 %v970_v23 }
  0x5e   :  { %460 = vmatpush2.bf16.msra.mxu1 %v933_v60  ;;  %708 = vmatprep.subr.bf16.mxu0 %v975_v24 }
  0x5f   :  { %461 = vmatprep.subr.bf16.mxu1 %v934_v61 }
  0x61   :  { %709 = vmatpush2.bf16.msra.mxu0 %v973_v25 }
  0x62   :  { %462 = vmatpush2.bf16.msra.mxu1 %v936_v62  ;;  %710 = vmatprep.subr.bf16.mxu0 %v978_v26 }
  0x63   :  { %463 = vmatprep.subr.bf16.mxu1 %v937_v63 }
  0x65   :  { %711 = vmatpush2.bf16.msra.mxu0 %v976_v27 }
  0x66   :  { %464 = vmatpush2.bf16.msra.mxu1 %v939_v0  ;;  %712 = vmatprep.subr.bf16.mxu0 %v981_v28 }
  0x67   :  { %465 = vmatprep.subr.bf16.mxu1 %v940_v1 }
  0x69   :  { %713 = vmatpush2.bf16.msra.mxu0 %v979_v29 }
  0x6a   :  { %466 = vmatpush2.bf16.msra.mxu1 %v942_v2  ;;  %714 = vmatprep.subr.bf16.mxu0 %v984_v48 }
  0x6d   :  { %715 = vmatpush2.bf16.msra.mxu0 %v982_v49 }
  0x6e   :  { %716 = vmatprep.subr.bf16.mxu0 %v987_v50 }
  0x71   :  { %717 = vmatpush2.bf16.msra.mxu0 %v985_v51 }
  0x72   :  { %718 = vmatprep.subr.bf16.mxu0 %v990_v52 }
  0x75   :  { %719 = vmatpush2.bf16.msra.mxu0 %v988_v53 }
  0xf7   :  { %v216_v33 = vpop.f32.mrf.mxu0 }
  0xf8   :  { %v217_v40 = vadd.f32 %v216_v33, %v92_v35 }
  0xf9   :  { %v218_v36 = vpop.f32.mrf.mxu0 }
  0xfa   :  { %v219_v38 = vadd.f32 %v218_v36, %v96_v34  ;;  %v225_v46 = vmax.f32 %v217_v40, 0.0 }
  0xfb   :  { %v220_v37 = vpop.f32.mrf.mxu0 }
  0xfc   :  { %v221_v39 = vadd.f32 %v220_v37, %v92_v35  ;;  %v226_v44 = vmax.f32 %v219_v38, 0.0 }
  0xfd   :  { %v222_v41 = vpop.f32.mrf.mxu0 }
  0xfe   :  { %v223_v42 = vadd.f32 %v222_v41, %v96_v34  ;;  %v227_v43 = vmax.f32 %v221_v39, 0.0  ;;  %v882_v34 = vld [vmem:[#allocation2] ss:$0 sm:$0xff] }
 0x100   :  { %v228_v45 = vmax.f32 %v223_v42, 0.0  ;;  %v229_v5 = vpack.c.bf16 %v227_v43, %v225_v46 }
 0x102   :  { %v230_v47 = vpack.c.bf16 %v228_v45, %v226_v44 }
 0x104   :  { %467 = vmatprep.mubr.bf16.mxu1 %v230_v47 }
 0x105   :  { %468 = vmatmul.mubr.bf16.vlgmr.msra.gmra.mxu1 %v229_v5 }
 0x1c5   :  { %v469_v55 = vpop.f32.mrf.mxu1 }
 0x1c6   :  { %v470_v62 = vadd.f32 %v469_v55, %v268_v57 }
 0x1c7   :  { %v471_v58 = vpop.f32.mrf.mxu1 }
 0x1c8   :  { %v472_v60 = vadd.f32 %v471_v58, %v272_v56  ;;  %v478_v4 = vmax.f32 %v470_v62, 0.0 }
 0x1c9   :  { %v473_v59 = vpop.f32.mrf.mxu1 }
 0x1ca   :  { %v474_v61 = vadd.f32 %v473_v59, %v268_v57  ;;  %v479_v2 = vmax.f32 %v472_v60, 0.0 }
 0x1cb   :  { %v475_v63 = vpop.f32.mrf.mxu1 }
 0x1cc   :  { %v476_v0 = vadd.f32 %v475_v63, %v272_v56  ;;  %v480_v1 = vmax.f32 %v474_v61, 0.0 }
 0x1ce   :  { %v481_v3 = vmax.f32 %v476_v0, 0.0  ;;  %v482_v7 = vpack.c.bf16 %v480_v1, %v478_v4 }
 0x1d0   :  { %v483_v6 = vpack.c.bf16 %v481_v3, %v479_v2 }
 0x1d2   :  { %720 = vmatprep.mubr.bf16.mxu0 %v483_v6 }
 0x1d3   :  { %721 = vmatmul.mubr.bf16.vlgmr.msra.gmra.mxu0 %v482_v7 }
 0x293   :  { %v722_v11 = vpop.f32.mrf.mxu0 }
 0x294   :  { %v723_v13 = vadd.f32 %v722_v11, %v521_v9 }
 0x295   :  { %v724_v14 = vpop.f32.mrf.mxu0 }
 0x296   :  { %v731_v15 = vmax.f32 %v723_v13, 0.0  ;;  %v725_v16 = vadd.f32 %v724_v14, %v525_v10 }
 0x297   :  { %v726_v19 = vpop.f32.mrf.mxu0 }
 0x298   :  { %v732_v20 = vmax.f32 %v725_v16, 0.0  ;;  %v727_v21 = vadd.f32 %v726_v19, %v521_v9  ;;  %v747_v25 = vmul.f32 %v740_v17, %v731_v15 }
 0x299   :  { %v728_v22 = vpop.f32.mrf.mxu0 }
 0x29a   :  { %v733_v23 = vmax.f32 %v727_v21, 0.0  ;;  %v729_v24 = vadd.f32 %v728_v22, %v525_v10  ;;  %v748_v26 = vmul.f32 %v744_v18, %v732_v20 }
 0x29c   :  { %v734_v27 = vmax.f32 %v729_v24, 0.0  ;;  %v751_v28 = vadd.f32 %v748_v26, %v747_v25  ;;  %v749_v29 = vmul.f32 %v740_v17, %v733_v23 }
 0x29e   :  { %v750_v32 = vmul.f32 %v744_v18, %v734_v27  ;;  %752 = vadd.xlane.f32.xlu0 %v751_v28 }
 0x2a0   :  { %v754_v33 = vadd.f32 %v750_v32, %v749_v29 }
 0x2a2   :  { %755 = vadd.xlane.f32.xlu0 %v754_v33 }
 0x327   :  { %v753_v35 = vpop.xlane.xlu0 %752 }
 0x328   :  { %v764_v31 = vadd.f32 %v882_v34, %v753_v35 }
 0x32a   :  { %767 = vst.msk [vmem:[#allocation8] sm:$0xff] %vm766_vm2, %v764_v31 }
 0x32b   :  { %v756_v30 = vpop.xlane.xlu0 %755 }
 0x331   :  { %v787_v36 = vld [vmem:[#allocation8] sm:$0x3] }
 0x332   :  { %788 = vst [vmem:[%s1177_s9] sm:$0x3] %v787_v36 }
 0x333   :  { %806 = vsyncpa [#allocation4], 1 }
 0x334   :  { %807 = vsyncpa [#allocation6], 1 }

</bundles_post_ra>
